<compile_context>
chip_gen: v5e
topology: v5e:2x2
jax: 0.10.0
libtpu: 0.0.40
codegen_flags: <defaults>
</compile_context>

<pallas_src>
import functools

import jax
import jax.numpy as jnp
from jax.experimental import pallas as pl
from jax.experimental.pallas import tpu as pltpu


# -----------------------------------------------------------------------------
# VMEM budget helpers
# -----------------------------------------------------------------------------
def _vmem_capacity_bytes():
    try:
        cap = int(pltpu.get_tpu_info().vmem_capacity_bytes)
        if cap > 0:
            return cap
    except Exception:
        pass
    return 64 * 1024 * 1024          # conservative default (v7x per-core VMEM)


def _vmem_limits():
    cap = _vmem_capacity_bytes()
    limit = min(cap * 3 // 4, 96 * 1024 * 1024)   # ~96 MiB on v5e/v6e, ~48 MiB on v7x
    budget = limit * 3 // 5                        # headroom for compiler temporaries
    return limit, budget


def _lane_dense_row_divisors(H, W):
    divs = [d for d in range(1, H + 1) if H % d == 0]
    return sorted([d for d in divs if (d * W) % 128 == 0 and d != H], reverse=True)


def _pick_rows_k1(H, W, Cin, Wp, planes, budget):
    def cost(tr):
        x_blk = Cin * tr * W
        o_blk = tr * Wp * planes
        tmp = 2 * tr * W * planes
        wts = 2 * (Cin * planes + planes)
        return 4 * (2 * (x_blk + o_blk) + tmp + wts)

    cands = _lane_dense_row_divisors(H, W) + [H]
    for tr in cands:
        if cost(tr) <= budget:
            return tr
    return cands[-2] if len(cands) > 1 else H


def _pick_rows_k2(H, W, planes, d3, Cout, pad, budget):
    half = d3 // 2
    use_im2col = planes < 128

    def cost(th):
        hs, wp = th + 2 * pad, W + 2 * pad
        slab = hs * wp * planes
        cat = th * W * d3
        io = 2 * 2 * Cout * th * W
        tmp = th * W * ((18 if use_im2col else 3) * planes + 2 * half)
        wts = 2 * (2 * 9 * planes * half + Cout * (d3 + 1) + 2 * half)
        return 4 * (slab + cat + io + tmp + wts)

    cands = [d for d in _lane_dense_row_divisors(H, W) if d >= pad] + [H]
    for th in cands:
        if cost(th) <= budget:
            return th
    return cands[-2] if len(cands) > 1 else H


# -----------------------------------------------------------------------------
# Kernel 1: conv1 (1x1) + folded BN1 + ReLU.
# Reads x as (Cin, TR*W) NCHW slabs (no wrapper transpose) and writes rows of
# the conv1 activation already WIDTH-padded with zeros -> no host-side pad and
# contiguous full-row DMAs for kernel 2's halo slab.
# -----------------------------------------------------------------------------
def _conv1x1_bn_relu_kernel(x_ref, w_ref, b_ref, o_ref, *, W, pad):
    # x_ref: (Cin, TR*W)  w_ref: (Cin, planes) BN1 scale pre-folded
    # o_ref: (TR, W + 2*pad, planes)
    TR = o_ref.shape[0]
    planes = o_ref.shape[-1]
    y = jax.lax.dot_general(
        x_ref[...], w_ref[...],
        dimension_numbers=(((0,), (0,)), ((), ())),
        preferred_element_type=jnp.float32)             # (TR*W, planes)
    y = jnp.maximum(y + b_ref[...], 0.0)
    o_ref[:, 0:pad, :] = jnp.zeros((TR, pad, planes), jnp.float32)
    o_ref[:, pad:pad + W, :] = y.reshape(TR, W, planes).astype(o_ref.dtype)
    o_ref[:, pad + W:, :] = jnp.zeros((TR, pad, planes), jnp.float32)


def conv1x1_bn_relu(x_ncs, w_scaled, bias_row, H, W, pad, TR, vmem_limit):
    N, Cin, S = x_ncs.shape
    planes = w_scaled.shape[1]
    Wp = W + 2 * pad
    kernel = functools.partial(_conv1x1_bn_relu_kernel, W=W, pad=pad)
    return pl.pallas_call(
        kernel,
        out_shape=jax.ShapeDtypeStruct((N, H, Wp, planes), jnp.float32),
        grid_spec=pltpu.PrefetchScalarGridSpec(
            num_scalar_prefetch=0,
            grid=(N, H // TR),
            in_specs=[
                pl.BlockSpec((pl.Squeezed(), Cin, TR * W), lambda n, r: (n, 0, r)),
                pl.BlockSpec((Cin, planes), lambda n, r: (0, 0)),
                pl.BlockSpec((1, planes), lambda n, r: (0, 0)),
            ],
            out_specs=pl.BlockSpec((pl.Squeezed(), TR, Wp, planes),
                                   lambda n, r: (n, r, 0, 0)),
        ),
        compiler_params=pltpu.CompilerParams(
            dimension_semantics=("parallel", "parallel"),
            vmem_limit_bytes=vmem_limit),
    )(x_ncs, w_scaled, bias_row)


# -----------------------------------------------------------------------------
# Kernel 2: fused [both dilated 3x3 convs + BN + ReLU] + conv3(1x1 over cat)
# + BN3 + residual add + ReLU, with a manually DMA'd halo row slab.
# Output written directly in NCHW channel-major layout (lane-dense stores).
# -----------------------------------------------------------------------------
def _fused_branches_proj_kernel(out1_ref, w2a_ref, b2a_ref, w2b_ref, b2b_ref,
                                w3_ref, b3_ref, res_ref, o_ref,
                                slab_ref, cat_ref, sem_ref,
                                *, H, W, TH, pad, r1, r2, use_im2col):
    # out1_ref : (N, H, Wp, planes)  width-padded conv1 output, raw HBM ref
    # slab_ref : (TH + 2*pad, Wp, planes) VMEM halo slab (single buffer)
    # cat_ref  : (TH*W, d3)  joint branch output -> one K=d3 conv3 matmul
    # res_ref / o_ref: (Cout, TH*W) channel-major (lane-dense) row tile
    n = pl.program_id(0)
    r = pl.program_id(1)
    R = pl.num_programs(1)
    planes = slab_ref.shape[-1]
    half = w2a_ref.shape[-1]
    Hs = TH + 2 * pad
    row0 = pl.multiple_of(r * TH, TH)

    # ---- manual halo-slab DMA (contiguous full-width rows) -------------------
    def body_cp():
        return pltpu.make_async_copy(out1_ref.at[n, pl.ds(row0, TH)],
                                     slab_ref.at[pl.ds(pad, TH)],
                                     sem_ref.at[0])

    def top_cp():
        src = jnp.maximum(row0 - pad, 0)
        return pltpu.make_async_copy(out1_ref.at[n, pl.ds(src, pad)],
                                     slab_ref.at[pl.ds(0, pad)],
                                     sem_ref.at[1])

    def bot_cp():
        src = jnp.minimum(row0 + TH, H - pad)
        return pltpu.make_async_copy(out1_ref.at[n, pl.ds(src, pad)],
                                     slab_ref.at[pl.ds(pad + TH, pad)],
                                     sem_ref.at[2])

    body_cp().start()

    @pl.when(r > 0)
    def _():
        top_cp().start()

    @pl.when(r < R - 1)
    def _():
        bot_cp().start()

    # zero-fill border halo rows (image top/bottom) while the DMAs fly;
    # column borders arrive pre-zeroed from kernel 1.
    zrow = jnp.zeros((pad, slab_ref.shape[1], planes), jnp.float32)

    @pl.when(r == 0)
    def _():
        slab_ref[0:pad, :, :] = zrow

    @pl.when(r == R - 1)
    def _():
        slab_ref[pad + TH:Hs, :, :] = zrow

    body_cp().wait()

    @pl.when(r > 0)
    def _():
        top_cp().wait()

    @pl.when(r < R - 1)
    def _():
        bot_cp().wait()

    # ---- both dilated 3x3 convs + BN + ReLU -> halves of the cat scratch -----
    center = slab_ref[pl.ds(pad, TH), pl.ds(pad, W), :].reshape(TH * W, planes)

    def patches(d):
        off = pad - d
        ps = []
        for ky in range(3):
            for kx in range(3):
                if ky == 1 and kx == 1:
                    ps.append(center)               # shared between both branches
                else:
                    p = slab_ref[pl.ds(off + ky * d, TH),
                                 pl.ds(off + kx * d, W), :]
                    ps.append(p.reshape(TH * W, planes))
        return ps

    def branch(d, w_ref, b_ref):
        ps = patches(d)
        if use_im2col:                              # small Cin: one deep K=9*Cin matmul
            col = jnp.concatenate(ps, axis=-1)      # (TH*W, 9*planes)
            y = jnp.dot(col, w_ref[...], preferred_element_type=jnp.float32)
        else:                                       # large Cin: 9 accumulating matmuls
            y = jnp.dot(ps[0], w_ref[0:planes, :],
                        preferred_element_type=jnp.float32)
            for t in range(1, 9):
                y = y + jnp.dot(ps[t], w_ref[t * planes:(t + 1) * planes, :],
                                preferred_element_type=jnp.float32)
        return jnp.maximum(y + b_ref[...], 0.0)     # (TH*W, half)

    cat_ref[:, 0:half] = branch(r1, w2a_ref, b2a_ref)
    cat_ref[:, half:2 * half] = branch(r2, w2b_ref, b2b_ref)

    # ---- conv3 as a single K=d3 contraction + BN3 + residual + ReLU ---------
    y = jax.lax.dot_general(w3_ref[...], cat_ref[...],
                            dimension_numbers=(((1,), (1,)), ((), ())),
                            preferred_element_type=jnp.float32)     # (Cout, TH*W)
    y = y + b3_ref[...] + res_ref[...]
    o_ref[...] = jnp.maximum(y, 0.0).astype(o_ref.dtype)


def fused_branches_proj(out1_padded, w2a, b2a_row, w2b, b2b_row, w3t, b3_col,
                        x_ncs, H, W, TH, pad, r1, r2, vmem_limit):
    N = out1_padded.shape[0]
    planes = out1_padded.shape[-1]
    Cout, d3 = w3t.shape
    half = d3 // 2
    S = H * W
    use_im2col = planes < 128
    kernel = functools.partial(_fused_branches_proj_kernel, H=H, W=W, TH=TH,
                               pad=pad, r1=r1, r2=r2, use_im2col=use_im2col)
    return pl.pallas_call(
        kernel,
        out_shape=jax.ShapeDtypeStruct((N, Cout, S), jnp.float32),
        grid_spec=pltpu.PrefetchScalarGridSpec(
            num_scalar_prefetch=0,
            grid=(N, H // TH),
            in_specs=[
                pl.BlockSpec(memory_space=pl.ANY),                      # conv1 act in HBM
                pl.BlockSpec((9 * planes, half), lambda n, r: (0, 0)),
                pl.BlockSpec((1, half), lambda n, r: (0, 0)),
                pl.BlockSpec((9 * planes, half), lambda n, r: (0, 0)),
                pl.BlockSpec((1, half), lambda n, r: (0, 0)),
                pl.BlockSpec((Cout, d3), lambda n, r: (0, 0)),
                pl.BlockSpec((Cout, 1), lambda n, r: (0, 0)),
                pl.BlockSpec((pl.Squeezed(), Cout, TH * W), lambda n, r: (n, 0, r)),
            ],
            out_specs=pl.BlockSpec((pl.Squeezed(), Cout, TH * W),
                                   lambda n, r: (n, 0, r)),
            scratch_shapes=[
                pltpu.VMEM((TH + 2 * pad, W + 2 * pad, planes), jnp.float32),
                pltpu.VMEM((TH * W, d3), jnp.float32),
                pltpu.SemaphoreType.DMA((3,)),
            ],
        ),
        compiler_params=pltpu.CompilerParams(
            dimension_semantics=("parallel", "parallel"),
            vmem_limit_bytes=vmem_limit),
    )(out1_padded, w2a, b2a_row, w2b, b2b_row, w3t, b3_col, x_ncs)


# -----------------------------------------------------------------------------
# Module wrapper
# -----------------------------------------------------------------------------
def fold_bn(gamma, beta, mean, var, eps=1e-5):
    scale = gamma / jnp.sqrt(var + eps)
    bias = beta - mean * scale
    return scale, bias


def bottleneck_ssma_forward(x_nchw, p):
    """x_nchw: (N, inplanes, H, W) float32 -> (N, inplanes, H, W)."""
    N, Cin, H, W = x_nchw.shape
    S = H * W
    r1, r2 = p["r1"], p["r2"]
    pad = max(r1, r2)
    planes = p["w1"].shape[1]
    half_d3 = p["w2a"].shape[-1]
    d3 = 2 * half_d3
    Cout = Cin

    x_ncs = x_nchw.reshape(N, Cin, S)

    # Fold BN scales into the conv weights (per output channel); keep biases.
    s1, b1 = fold_bn(p["bn1_g"], p["bn1_b"], p["bn1_m"], p["bn1_v"])
    s2a, b2a = fold_bn(p["bn2a_g"], p["bn2a_b"], p["bn2a_m"], p["bn2a_v"])
    s2b, b2b = fold_bn(p["bn2b_g"], p["bn2b_b"], p["bn2b_m"], p["bn2b_v"])
    s3, b3 = fold_bn(p["bn3_g"], p["bn3_b"], p["bn3_m"], p["bn3_v"])

    w1s = p["w1"] * s1[None, :]                                      # (Cin, planes)
    w2a_s = p["w2a"].reshape(9 * planes, half_d3) * s2a[None, :]
    w2b_s = p["w2b"].reshape(9 * planes, half_d3) * s2b[None, :]
    w3_full = jnp.concatenate([p["w3a"], p["w3b"]], axis=0)          # (d3, Cout)
    w3t = (w3_full * s3[None, :]).T                                  # (Cout, d3)

    vmem_limit, budget = _vmem_limits()

    # Kernel 1: conv1 + bn1 + relu; output already width-padded with zeros.
    TR = _pick_rows_k1(H, W, Cin, W + 2 * pad, planes, budget)
    out1 = conv1x1_bn_relu(x_ncs, w1s, b1[None, :], H, W, pad, TR,
                           vmem_limit)                               # (N, H, Wp, planes)

    # Kernel 2: dilated branches + conv3 + bn3 + residual + relu (halo-slab DMA).
    TH = _pick_rows_k2(H, W, planes, d3, Cout, pad, budget)
    y = fused_branches_proj(out1, w2a_s, b2a[None, :], w2b_s, b2b[None, :],
                            w3t, b3[:, None], x_ncs,
                            H, W, TH, pad, r1, r2, vmem_limit)       # (N, Cout, S)
    return y.reshape(N, Cout, H, W)


# -----------------------------------------------------------------------------
# Pure-JAX reference (correctness check)
# -----------------------------------------------------------------------------
def reference_forward(x_nchw, p):
    x = jnp.transpose(x_nchw, (0, 2, 3, 1))

    def bn(y, g, b, m, v, eps=1e-5):
        return (y - m) / jnp.sqrt(v + eps) * g + b

    def dconv(y, w9, cin, cout, dil):
        w_hwio = w9.reshape(3, 3, cin, cout)
        return jax.lax.conv_general_dilated(
            y, w_hwio, window_strides=(1, 1),
            padding=[(dil, dil), (dil, dil)], rhs_dilation=(dil, dil),
            dimension_numbers=("NHWC", "HWIO", "NHWC"))

    out = jnp.maximum(bn(jnp.einsum("nhwc,cd->nhwd", x, p["w1"]),
                         p["bn1_g"], p["bn1_b"], p["bn1_m"], p["bn1_v"]), 0.0)
    planes = p["w1"].shape[1]
    half_d3 = p["w2a"].shape[-1]
    oa = jnp.maximum(bn(dconv(out, p["w2a"], planes, half_d3, p["r1"]),
                        p["bn2a_g"], p["bn2a_b"], p["bn2a_m"], p["bn2a_v"]), 0.0)
    ob = jnp.maximum(bn(dconv(out, p["w2b"], planes, half_d3, p["r2"]),
                        p["bn2b_g"], p["bn2b_b"], p["bn2b_m"], p["bn2b_v"]), 0.0)
    cat = jnp.concatenate([oa, ob], axis=-1)
    w3 = jnp.concatenate([p["w3a"], p["w3b"]], axis=0)
    y = bn(jnp.einsum("nhwc,cd->nhwd", cat, w3),
           p["bn3_g"], p["bn3_b"], p["bn3_m"], p["bn3_v"])
    y = jnp.maximum(y + x, 0.0)
    return jnp.transpose(y, (0, 3, 1, 2))


# -----------------------------------------------------------------------------
# Deterministic parameter init + driver
# -----------------------------------------------------------------------------
def make_params(key, inplanes, planes, d3, r1, r2):
    half_d3 = d3 // 2
    ks = list(jax.random.split(key, 22))

    def u(k, shape, s=0.3):
        return jax.random.uniform(k, shape, jnp.float32, -s, s)

    return {
        "r1": r1, "r2": r2,
        "w1": u(ks[0], (inplanes, planes)),
        "w2a": u(ks[1], (9, planes, half_d3)),   # (kh*kw, Cin, Cout)
        "w2b": u(ks[2], (9, planes, half_d3)),
        "w3a": u(ks[3], (half_d3, inplanes)),    # first half of conv3 weight
        "w3b": u(ks[4], (half_d3, inplanes)),    # second half of conv3 weight
        "bn1_g": 1.0 + u(ks[5], (planes,), 0.1),
        "bn1_b": u(ks[6], (planes,), 0.1),
        "bn1_m": u(ks[7], (planes,), 0.1),
        "bn1_v": 1.0 + u(ks[8], (planes,), 0.1) ** 2,
        "bn2a_g": 1.0 + u(ks[9], (half_d3,), 0.1),
        "bn2a_b": u(ks[10], (half_d3,), 0.1),
        "bn2a_m": u(ks[11], (half_d3,), 0.1),
        "bn2a_v": 1.0 + u(ks[12], (half_d3,), 0.1) ** 2,
        "bn2b_g": 1.0 + u(ks[13], (half_d3,), 0.1),
        "bn2b_b": u(ks[14], (half_d3,), 0.1),
        "bn2b_m": u(ks[15], (half_d3,), 0.05),
        "bn2b_v": 1.0 + u(ks[16], (half_d3,), 0.1) ** 2,
        "bn3_g": 1.0 + u(ks[17], (inplanes,), 0.1),
        "bn3_b": u(ks[18], (inplanes,), 0.1),
        "bn3_m": u(ks[19], (inplanes,), 0.05),
        "bn3_v": 1.0 + u(ks[20], (inplanes,), 0.1) ** 2,
    }


if __name__ == "__main__":
    key = jax.random.PRNGKey(0)
    kx, kp = jax.random.split(key)

    # Shapes consistent with the module: inplanes=8, planes=8, d3=8,
    # dilation rates r1=1, r2=2, stride=1, downsample=None, drop_out=False.
    N, inplanes, H, W = 2, 8, 16, 16
    planes, d3, r1, r2 = 8, 8, 1, 2

    x = jax.random.normal(kx, (N, inplanes, H, W), jnp.float32)
    params = make_params(kp, inplanes, planes, d3, r1, r2)

    out = jax.block_until_ready(bottleneck_ssma_forward(x, params))
    ref = jax.block_until_ready(reference_forward(x, params))

    assert out.shape == (N, inplanes, H, W)
    max_err = float(jnp.max(jnp.abs(out - ref)))
    assert jnp.allclose(out, ref, atol=2e-4, rtol=2e-4), max_err

    print("KERNEL_OK")
</pallas_src>

<mosaic_0001>
module attributes {stable_mosaic.version = 11 : i64} {
  func.func @_conv1x1_bn_relu_kernel(%arg0: i32, %arg1: i32, %arg2: memref<1x8x128xf32, #tpu.memory_space<vmem>>, %arg3: memref<8x8xf32, #tpu.memory_space<vmem>>, %arg4: memref<1x8xf32, #tpu.memory_space<vmem>>, %arg5: memref<1x8x20x8xf32, #tpu.memory_space<vmem>>) attributes {dimension_semantics = [#tpu.dimension_semantics<parallel>, #tpu.dimension_semantics<parallel>], iteration_bounds = array<i64: 2, 2>, scalar_prefetch = 0 : i64, scratch_operands = 0 : i64, tpu.core_type = #tpu.core_type<tc>, window_params = [{transform_indices = @transform_0, window_bounds = array<i64: 1, 8, 128>}, {pipeline_mode = #tpu.pipeline_mode<synchronous>, transform_indices = @transform_1, window_bounds = array<i64: 8, 8>}, {pipeline_mode = #tpu.pipeline_mode<synchronous>, transform_indices = @transform_2, window_bounds = array<i64: 1, 8>}, {transform_indices = @transform_3, window_bounds = array<i64: 1, 8, 20, 8>}]} {
    %c0 = arith.constant 0 : index
    %c0_0 = arith.constant 0 : index
    %c0_1 = arith.constant 0 : index
    %0 = vector.load %arg2[%c0, %c0_0, %c0_1] : memref<1x8x128xf32, #tpu.memory_space<vmem>>, vector<1x8x128xf32>
    %1 = vector.shape_cast %0 : vector<1x8x128xf32> to vector<8x128xf32>
    %c0_2 = arith.constant 0 : index
    %c0_3 = arith.constant 0 : index
    %2 = vector.load %arg3[%c0_2, %c0_3] : memref<8x8xf32, #tpu.memory_space<vmem>>, vector<8x8xf32>
    %cst = arith.constant dense<0.000000e+00> : vector<128x8xf32>
    %3 = tpu.matmul %1, %2, %cst {dimension_numbers = #tpu.dot_dimension_numbers<[0], [0], [1], [1], [0, 1, 1, 1], [], []>} : vector<8x128xf32>, vector<8x8xf32>, vector<128x8xf32> -> vector<128x8xf32>
    %c0_4 = arith.constant 0 : index
    %c0_5 = arith.constant 0 : index
    %4 = vector.load %arg4[%c0_4, %c0_5] : memref<1x8xf32, #tpu.memory_space<vmem>>, vector<1x8xf32>
    %5 = vector.broadcast %4 : vector<1x8xf32> to vector<128x8xf32>
    %6 = arith.addf %3, %5 : vector<128x8xf32>
    %cst_6 = arith.constant 0.000000e+00 : f32
    %7 = vector.broadcast %cst_6 : f32 to vector<128x8xf32>
    %8 = arith.maximumf %6, %7 : vector<128x8xf32>
    %cst_7 = arith.constant 0.000000e+00 : f32
    %9 = vector.broadcast %cst_7 : f32 to vector<8x2x8xf32>
    %c0_8 = arith.constant 0 : index
    %c0_9 = arith.constant 0 : index
    %c0_10 = arith.constant 0 : index
    %c0_11 = arith.constant 0 : index
    %10 = vector.load %arg5[%c0_8, %c0_9, %c0_10, %c0_11] : memref<1x8x20x8xf32, #tpu.memory_space<vmem>>, vector<1x8x2x8xf32>
    %11 = vector.shape_cast %10 : vector<1x8x2x8xf32> to vector<8x2x8xf32>
    %12 = vector.shape_cast %9 : vector<8x2x8xf32> to vector<1x8x2x8xf32>
    tpu.vector_store %arg5[%c0_8, %c0_9, %c0_10, %c0_11], %12 {strides = array<i32>} : memref<1x8x20x8xf32, #tpu.memory_space<vmem>>, vector<1x8x2x8xf32>,
    %13 = vector.shape_cast %8 : vector<128x8xf32> to vector<8x16x8xf32>
    %c0_12 = arith.constant 0 : index
    %c0_13 = arith.constant 0 : index
    %c2 = arith.constant 2 : index
    %c0_14 = arith.constant 0 : index
    %14 = vector.load %arg5[%c0_12, %c0_13, %c2, %c0_14] : memref<1x8x20x8xf32, #tpu.memory_space<vmem>>, vector<1x8x16x8xf32>
    %15 = vector.shape_cast %14 : vector<1x8x16x8xf32> to vector<8x16x8xf32>
    %16 = vector.shape_cast %13 : vector<8x16x8xf32> to vector<1x8x16x8xf32>
    tpu.vector_store %arg5[%c0_12, %c0_13, %c2, %c0_14], %16 {strides = array<i32>} : memref<1x8x20x8xf32, #tpu.memory_space<vmem>>, vector<1x8x16x8xf32>,
    %cst_15 = arith.constant 0.000000e+00 : f32
    %17 = vector.broadcast %cst_15 : f32 to vector<8x2x8xf32>
    %c0_16 = arith.constant 0 : index
    %c0_17 = arith.constant 0 : index
    %c18 = arith.constant 18 : index
    %c0_18 = arith.constant 0 : index
    %18 = vector.load %arg5[%c0_16, %c0_17, %c18, %c0_18] : memref<1x8x20x8xf32, #tpu.memory_space<vmem>>, vector<1x8x2x8xf32>
    %19 = vector.shape_cast %18 : vector<1x8x2x8xf32> to vector<8x2x8xf32>
    %20 = vector.shape_cast %17 : vector<8x2x8xf32> to vector<1x8x2x8xf32>
    tpu.vector_store %arg5[%c0_16, %c0_17, %c18, %c0_18], %20 {strides = array<i32>} : memref<1x8x20x8xf32, #tpu.memory_space<vmem>>, vector<1x8x2x8xf32>,
    return
  }
  func.func @transform_0(%arg0: i32, %arg1: i32) -> (i32, i32, i32) {
    %c0_i32 = arith.constant 0 : i32
    %c0_i32_0 = arith.constant 0 : i32
    return %arg0, %c0_i32, %arg1 : i32, i32, i32
  }
  func.func @transform_1(%arg0: i32, %arg1: i32) -> (i32, i32) {
    %c0_i32 = arith.constant 0 : i32
    %c0_i32_0 = arith.constant 0 : i32
    %c0_i32_1 = arith.constant 0 : i32
    return %c0_i32, %c0_i32_0 : i32, i32
  }
  func.func @transform_2(%arg0: i32, %arg1: i32) -> (i32, i32) {
    %c0_i32 = arith.constant 0 : i32
    %c0_i32_0 = arith.constant 0 : i32
    %c0_i32_1 = arith.constant 0 : i32
    return %c0_i32, %c0_i32_0 : i32, i32
  }
  func.func @transform_3(%arg0: i32, %arg1: i32) -> (i32, i32, i32, i32) {
    %c0_i32 = arith.constant 0 : i32
    %c0_i32_0 = arith.constant 0 : i32
    %c0_i32_1 = arith.constant 0 : i32
    return %arg0, %arg1, %c0_i32, %c0_i32_0 : i32, i32, i32, i32
  }
}

</mosaic_0001>

<bundles_post_ra>
// kernel: tpu_custom_call.1
= control target key start
LH: loop header
LB: loop body
LE: loop exit
PB: predicated region body
PF: predicated region fallthrough
CT: control target
= control target key end

     0   :  { %s1044_s0 = inlined_call_operand.hbm [shape: f32[2,8,256], index: 0, kind: input, shape index: {}]   ;;  %s1045_s1 = inlined_call_operand.hbm [shape: f32[8,8], index: 1, kind: input, shape index: {}]   ;;  %s1046_s2 = inlined_call_operand.vmem [shape: f32[1,8], index: 2, kind: input, shape index: {}]   ;;  %s1047_s3 = inlined_call_operand.vmem [shape: f32[2,16,20,8], index: 3, kind: output, shape index: {}]  }
   0x1   :  { %1050 = sst [smem:[#allocation10_spill]] %s1045_s1 }
   0x2   :  { %8 = vsyncpa [#allocation3], 0 }
   0x3   :  { %10 = vsyncpa [#allocation3 + $0x1], 0 }
   0x4   :  { %11 = vsyncpa [#allocation5], 0  ;;  %s822_s12 = smov 0   ;;  %s824_s13 = smov 0  }
   0x5   :  { %s826_s14 = smov 0   ;;  %s828_s15 = smov 0  }
   0x6   :  { %s830_s16 = smov 0   ;;  %s832_s17 = smov 0  }
   0x7   :  { %s834_s18 = smov 0   ;;  %s836_s19 = smov 0  }
   0x8 LB: > { %s548_s20 = sadd.s32 4294967295, %s798_s19   ;;  %p51_p0 = scmp.ne.s32.totalorder %s774_s13, %s770_s12  ;;  %s798_s19 = sphi %s836_s19, %s17_s19   ;;  %s794_s18 = sphi %s834_s18, %s1066_s18   ;;  %s790_s17 = sphi %s832_s17, %s1065_s17   ;;  %s786_s16 = sphi %s830_s16, %s1064_s16   ;;  %s782_s15 = sphi %s828_s15, %s1063_s15   ;;  %s778_s14 = sphi %s826_s14, %s1062_s14   ;;  %s774_s13 = sphi %s824_s13, %s1061_s13   ;;  %s770_s12 = sphi %s822_s12, %s1060_s12  }
   0x9   : > { %p862_p1 = scmp.eq.s32.totalorder %s548_s20, 0  ;;  %p550_p2 = scmp.ge.s32.totalorder %s798_s19, 1 }
   0xa   : > { %p132_p3 = scmp.lt.s32.totalorder %s798_s19, 5  ;;  %s1053_s1 = sld [smem:[#allocation10_spill]] }
   0xb   : > { %p870_p4 = por %p862_p1, %p51_p0  ;;  %s800_s27 = smov [#allocation4]  }
   0xc   : > { %p877_p5 = pnand %p550_p2, %p132_p3  ;;  %s146_s28 = sshll.u32 %s800_s27, 4  ;;  %s147_s28 = int_to_ptr.vmem [resolvable:$true] %s146_s28 }
   0xd   : > { %s26_s29 = sadd.s32 1, %s790_s17  ;;  %s29_s30 = sadd.s32 1, %s794_s18 }
   0xe   : > { %p590_p6 = pneg %p877_p5  ;;  %p27_p8 = scmp.ge.s32.totalorder %s26_s29, 2 }
   0xf   : > { %s38_s4 = sadd.s32 1, %s778_s14  ;;  %p45_p9 = scmp.ne.s32.totalorder %s778_s14, %s774_s13 }
  0x10   : > { %s144_s25 = sshll.u32 %s1053_s1, 4  ;;  %p591_p7 = pnand %p590_p6, %p862_p1  ;;  %s145_s25 = int_to_ptr.hbm [resolvable:$true] %s144_s25 }
  0x11   : > { %s1068_s29 = smov (%p27_p8, %s26_s29), 0  ;;  %s1070_s30 = smov (!%p27_p8, %s29_s30), %s794_s18 }
  0x12   : > { %593 = dma.hbm_to_vmem [thread:$0]  (!%p591_p7), %s145_s25, 128, %s147_s28, [#allocation5]  }
  0x13   : > { %1055 = sst [smem:[#allocation8_spill]] %s1068_s29  ;;  %s34_s5 = ssub.s32 %s790_s17, %s1068_s29 }
  0x14   : > { %p46_p10 = scmp.eq.s32.totalorder %s798_s19, 0  ;;  %p31_p11 = scmp.ge.s32.totalorder %s1070_s30, 2 }
  0x15   : > { %p599_p12 = scmp.lt.s32.totalorder %s798_s19, 4  ;;  %s160_s7 = sand.u32 1, %s778_s14  }
  0x16   : > { %p897_p13 = por %p46_p10, %p45_p9  ;;  %s1072_s30 = smov (%p31_p11, %s1070_s30), 0 }
  0x17   : > { %1057 = sst [smem:[#allocation9_spill]] %s1072_s30  ;;  %s553_s8 = sshll.u32 %s160_s7, 3 }
  0x18   : > { %s33_s9 = ssub.s32 %s794_s18, %s1072_s30  ;;  %s554_s11 = sshll.u32 %s794_s18, 1 }
  0x19   : > { %s35_s10 = sor.u32 %s34_s5, %s33_s9  ;;  %s168_s12 = sadd.s32 %s790_s17, %s554_s11 }
  0x1a   : > { %p36_p0 = scmp.eq.s32.totalorder %s35_s10, 0  ;;  %s555_s20 = sshll.u32 %s168_s12, 3 }
  0x1b   : > { %s164_s23 = scalar_lea.vmem [#allocation2], %s553_s8  ;;  %s170_s1 = scalar_lea.hbm %s1044_s0, %s555_s20 }
  0x1c   : > { %s174_s24 = sshll.u32 %s164_s23, 4  ;;  %s172_s29 = sshll.u32 %s170_s1, 4  ;;  %s175_s24 = int_to_ptr.vmem [resolvable:$true] %s174_s24  ;;  %s173_s29 = int_to_ptr.hbm [resolvable:$true] %s172_s29 }
  0x1d   : > { %s909_s25 = scalar_select %p36_p0, %s778_s14, %s38_s4  }
  0x1e   : > { %p595_p2 = pnand %p599_p12, %p897_p13  ;;  %s161_s30 = scalar_lea.sflag [#allocation3], %s160_s7 }
  0x1f   : > { %183 = sbr.rel (%p877_p5) target bundleno = 462 (0x1ce), region = 32  ;;  %s185_s5 = sand.u32 (!%p877_p5), 1, %s774_s13  }
  0x20   : > { %597 = dma.hbm_to_vmem [thread:$0]  (!%p595_p2), %s173_s29, 128, %s175_s24, %s161_s30  }
  0x21   : > { %s557_s4 = sshll.u32 (!%p877_p5), %s185_s5, 3  ;;  %s186_s8 = scalar_lea.sflag (!%p877_p5), [#allocation3], %s185_s5 }
  0x22   : > { %s189_s9 = scalar_lea.vmem (!%p877_p5), [#allocation2], %s557_s4 }
  0x24   : > { %761 = dma.done.wait (%p870_p4), %s186_s8, 128  }
  0x25   : > { %763 = vsyncadd (%p870_p4), %s186_s8, 4294967168 }
  0x26   : > { %765 = dma.done.wait (%p862_p1), [#allocation5], 128  }
  0x27   : > { %767 = vsyncadd (%p862_p1), [#allocation5], 4294967168  ;;  %v234_v0 = vld [vmem:[%s189_s9] sm:$0xff]  ;;  %v235_v1 = vld [vmem:[#allocation4] sm:$0xff]  ;;  %vm272_vm0 = vcmask 64512   ;;  %s559_s1 = sshll.u32 %s782_s15, 3 }
  0x28   : > { %240 = vxpose.xlu0.b32.start.end [1/1] (short) %v234_v0, 128  ;;  %336 = vmatpush.msra.mxu0 %v235_v1  ;;  %p224_p1 = scmp.lt.s32.totalorder %s786_s16, 1  ;;  %p226_p3 = scmp.lt.s32.totalorder %s559_s1, 15  ;;  %vm402_vm1 = vcmask 58368   ;;  %v801_v15 = vmov 0.0   ;;  %v667_v19 = vld [vmem:[%s1046_s2] ss:$0 sm:$0xff] }
  0x29   : > { %579 = vmatpush.msra.mxu1 %v235_v1  ;;  %580 = vmatpush.msra.mxu2 %v235_v1 }
  0x2a   : > { %581 = vmatpush.msra.mxu3 %v235_v1  ;;  %s1074_s16 = smov (!%p224_p1, %s786_s16), 1  ;;  %s1076_s1 = smov (!%p226_p3, %s559_s1), 15 }
  0x2b   : > { %s583_s21 = smul.u32 48, %s1074_s16 }
  0x2c   : > { %s582_s22 = smul.u32 3, %s1076_s1 }
  0x2e   : > { %s230_s26 = sadd.s32 %s583_s21, %s582_s22 }
  0x2f   : > { %s560_s29 = sshll.u32 %s230_s26, 3 }
  0x30   : > { %s948_s15 = scalar_lea.vmem %s1047_s3, %s560_s29 }
  0x31   : > { %403 = vst.msk [vmem:[%s948_s15] sm:$0x3] %vm402_vm1, %v801_v15 }
  0x32   : > { %404 = vst.msk [vmem:[%s948_s15 + $0x18] sm:$0x3] %vm402_vm1, %v801_v15 }
  0x33   : > { %405 = vst.msk [vmem:[%s948_s15 + $0x30] sm:$0x3] %vm402_vm1, %v801_v15 }
  0x34   : > { %406 = vst.msk [vmem:[%s948_s15 + $0x48] sm:$0x3] %vm402_vm1, %v801_v15 }
  0x35   : > { %407 = vst.msk [vmem:[%s948_s15 + $0x60] sm:$0x3] %vm402_vm1, %v801_v15 }
  0x36   : > { %408 = vst.msk [vmem:[%s948_s15 + $0x78] sm:$0x3] %vm402_vm1, %v801_v15 }
  0x37   : > { %409 = vst.msk [vmem:[%s948_s15 + $0x90] sm:$0x3] %vm402_vm1, %v801_v15 }
  0x38   : > { %410 = vst.msk [vmem:[%s948_s15 + $0xa8] sm:$0x3] %vm402_vm1, %v801_v15 }
  0x39   : > { %427 = vst.msk [vmem:[%s948_s15 + $0x12] sm:$0x3] %vm402_vm1, %v801_v15 }
  0x3a   : > { %428 = vst.msk [vmem:[%s948_s15 + $0x2a] sm:$0x3] %vm402_vm1, %v801_v15 }
  0x3b   : > { %429 = vst.msk [vmem:[%s948_s15 + $0x42] sm:$0x3] %vm402_vm1, %v801_v15 }
  0x3c   : > { %430 = vst.msk [vmem:[%s948_s15 + $0x5a] sm:$0x3] %vm402_vm1, %v801_v15 }
  0x3d   : > { %431 = vst.msk [vmem:[%s948_s15 + $0x72] sm:$0x3] %vm402_vm1, %v801_v15 }
  0x3e   : > { %432 = vst.msk [vmem:[%s948_s15 + $0x8a] sm:$0x3] %vm402_vm1, %v801_v15 }
  0x3f   : > { %433 = vst.msk [vmem:[%s948_s15 + $0xa2] sm:$0x3] %vm402_vm1, %v801_v15 }
  0x40   : > { %434 = vst.msk [vmem:[%s948_s15 + $0xba] sm:$0x3] %vm402_vm1, %v801_v15 }
  0xcc   : > { %v256_v2 = vpop.trf.xlu0 }
  0xcd   : > { %561 = vmatmul.msk.f32.vlgmr.msra.gmra.mxu0 %vm272_vm0, %v256_v2 }
  0xd4   : > { %v257_v3 = vpop.trf.xlu0 }
  0xd5   : > { %562 = vmatmul.msk.f32.gmra.mxu0 %vm272_vm0, %v257_v3 }
  0xdc   : > { %v258_v4 = vpop.trf.xlu0 }
  0xdd   : > { %563 = vmatmul.msk.f32.gmra.mxu0 %vm272_vm0, %v258_v4 }
  0xe4   : > { %v259_v5 = vpop.trf.xlu0 }
  0xe5   : > { %564 = vmatmul.msk.f32.gmra.mxu0 %vm272_vm0, %v259_v5 }
  0xec   : > { %v260_v6 = vpop.trf.xlu0 }
  0xed   : > { %565 = vmatmul.msk.f32.vlgmr.msra.gmra.mxu1 %vm272_vm0, %v260_v6 }
  0xf4   : > { %v261_v7 = vpop.trf.xlu0 }
  0xf5   : > { %566 = vmatmul.msk.f32.gmra.mxu1 %vm272_vm0, %v261_v7 }
  0xfc   : > { %v262_v8 = vpop.trf.xlu0 }
  0xfd   : > { %567 = vmatmul.msk.f32.gmra.mxu1 %vm272_vm0, %v262_v8 }
 0x104   : > { %v263_v9 = vpop.trf.xlu0 }
 0x105   : > { %568 = vmatmul.msk.f32.gmra.mxu1 %vm272_vm0, %v263_v9 }
 0x10c   : > { %v264_v10 = vpop.trf.xlu0 }
 0x10d   : > { %569 = vmatmul.msk.f32.vlgmr.msra.gmra.mxu2 %vm272_vm0, %v264_v10 }
 0x114   : > { %v265_v11 = vpop.trf.xlu0 }
 0x115   : > { %570 = vmatmul.msk.f32.gmra.mxu2 %vm272_vm0, %v265_v11 }
 0x11c   : > { %v266_v12 = vpop.trf.xlu0 }
 0x11d   : > { %571 = vmatmul.msk.f32.gmra.mxu2 %vm272_vm0, %v266_v12 }
 0x124   : > { %v267_v13 = vpop.trf.xlu0 }
 0x125   : > { %572 = vmatmul.msk.f32.gmra.mxu2 %vm272_vm0, %v267_v13 }
 0x12c   : > { %v268_v14 = vpop.trf.xlu0 }
 0x12d   : > { %573 = vmatmul.msk.f32.vlgmr.msra.gmra.mxu3 %vm272_vm0, %v268_v14 }
 0x134   : > { %v269_v16 = vpop.trf.xlu0 }
 0x135   : > { %574 = vmatmul.msk.f32.gmra.mxu3 %vm272_vm0, %v269_v16 }
 0x13c   : > { %v270_v17 = vpop.trf.xlu0 }
 0x13d   : > { %575 = vmatmul.msk.f32.gmra.mxu3 %vm272_vm0, %v270_v17 }
 0x144   : > { %v271_v18 = vpop.trf.xlu0 }
 0x145   : > { %576 = vmatmul.msk.f32.gmra.mxu3 %vm272_vm0, %v271_v18 }
 0x14a   : > { %v338_v20 = vpop.f32.mrf.mxu0 }
 0x14b   : > { %v339_v21 = vadd.f32 %v667_v19, %v338_v20 }
 0x14d   : > { %v386_v22 = vmax.f32 %v339_v21, 0.0 }
 0x14f   : > { %411 = vst.msk [vmem:[%s948_s15 + $0x2] sm:$0xff] %vm272_vm0, %v386_v22 }
 0x152   : > { %v341_v23 = vpop.f32.mrf.mxu0 }
 0x153   : > { %v342_v24 = vadd.f32 %v667_v19, %v341_v23 }
 0x155   : > { %v387_v25 = vmax.f32 %v342_v24, 0.0 }
 0x157   : > { %412 = vst.msk [vmem:[%s948_s15 + $0xa] sm:$0xff] %vm272_vm0, %v387_v25 }
 0x15a   : > { %v344_v26 = vpop.f32.mrf.mxu0 }
 0x15b   : > { %v345_v27 = vadd.f32 %v667_v19, %v344_v26 }
 0x15d   : > { %v388_v28 = vmax.f32 %v345_v27, 0.0 }
 0x15f   : > { %413 = vst.msk [vmem:[%s948_s15 + $0x1a] sm:$0xff] %vm272_vm0, %v388_v28 }
 0x162   : > { %v347_v29 = vpop.f32.mrf.mxu0 }
 0x163   : > { %v348_v30 = vadd.f32 %v667_v19, %v347_v29 }
 0x165   : > { %v389_v31 = vmax.f32 %v348_v30, 0.0 }
 0x167   : > { %414 = vst.msk [vmem:[%s948_s15 + $0x22] sm:$0xff] %vm272_vm0, %v389_v31 }
 0x16a   : > { %v350_v32 = vpop.f32.mrf.mxu1 }
 0x16b   : > { %v351_v33 = vadd.f32 %v667_v19, %v350_v32 }
 0x16d   : > { %v390_v34 = vmax.f32 %v351_v33, 0.0 }
 0x16f   : > { %415 = vst.msk [vmem:[%s948_s15 + $0x32] sm:$0xff] %vm272_vm0, %v390_v34 }
 0x172   : > { %v353_v35 = vpop.f32.mrf.mxu1 }
 0x173   : > { %v354_v36 = vadd.f32 %v667_v19, %v353_v35 }
 0x175   : > { %v391_v37 = vmax.f32 %v354_v36, 0.0 }
 0x177   : > { %416 = vst.msk [vmem:[%s948_s15 + $0x3a] sm:$0xff] %vm272_vm0, %v391_v37 }
 0x17a   : > { %v356_v38 = vpop.f32.mrf.mxu1 }
 0x17b   : > { %v357_v39 = vadd.f32 %v667_v19, %v356_v38 }
 0x17d   : > { %v392_v40 = vmax.f32 %v357_v39, 0.0 }
 0x17f   : > { %417 = vst.msk [vmem:[%s948_s15 + $0x4a] sm:$0xff] %vm272_vm0, %v392_v40 }
 0x182   : > { %v359_v41 = vpop.f32.mrf.mxu1 }
 0x183   : > { %v360_v42 = vadd.f32 %v667_v19, %v359_v41 }
 0x185   : > { %v393_v43 = vmax.f32 %v360_v42, 0.0 }
 0x187   : > { %418 = vst.msk [vmem:[%s948_s15 + $0x52] sm:$0xff] %vm272_vm0, %v393_v43 }
 0x190   : > { %v362_v44 = vpop.f32.mrf.mxu2 }
 0x191   : > { %v363_v45 = vadd.f32 %v667_v19, %v362_v44 }
 0x193   : > { %v394_v46 = vmax.f32 %v363_v45, 0.0 }
 0x195   : > { %419 = vst.msk [vmem:[%s948_s15 + $0x62] sm:$0xff] %vm272_vm0, %v394_v46 }
 0x198   : > { %v365_v47 = vpop.f32.mrf.mxu2 }
 0x199   : > { %v366_v48 = vadd.f32 %v667_v19, %v365_v47 }
 0x19b   : > { %v395_v49 = vmax.f32 %v366_v48, 0.0 }
 0x19d   : > { %420 = vst.msk [vmem:[%s948_s15 + $0x6a] sm:$0xff] %vm272_vm0, %v395_v49 }
 0x1a0   : > { %v368_v50 = vpop.f32.mrf.mxu2 }
 0x1a1   : > { %v369_v51 = vadd.f32 %v667_v19, %v368_v50 }
 0x1a3   : > { %v396_v52 = vmax.f32 %v369_v51, 0.0 }
 0x1a5   : > { %421 = vst.msk [vmem:[%s948_s15 + $0x7a] sm:$0xff] %vm272_vm0, %v396_v52 }
 0x1a8   : > { %v371_v53 = vpop.f32.mrf.mxu2 }
 0x1a9   : > { %v372_v54 = vadd.f32 %v667_v19, %v371_v53 }
 0x1ab   : > { %v397_v55 = vmax.f32 %v372_v54, 0.0 }
 0x1ad   : > { %422 = vst.msk [vmem:[%s948_s15 + $0x82] sm:$0xff] %vm272_vm0, %v397_v55 }
 0x1b0   : > { %v374_v56 = vpop.f32.mrf.mxu3 }
 0x1b1   : > { %v375_v57 = vadd.f32 %v667_v19, %v374_v56 }
 0x1b3   : > { %v398_v58 = vmax.f32 %v375_v57, 0.0 }
 0x1b5   : > { %423 = vst.msk [vmem:[%s948_s15 + $0x92] sm:$0xff] %vm272_vm0, %v398_v58 }
 0x1b8   : > { %v377_v59 = vpop.f32.mrf.mxu3 }
 0x1b9   : > { %v378_v60 = vadd.f32 %v667_v19, %v377_v59 }
 0x1bb   : > { %v399_v61 = vmax.f32 %v378_v60, 0.0 }
 0x1bd   : > { %424 = vst.msk [vmem:[%s948_s15 + $0x9a] sm:$0xff] %vm272_vm0, %v399_v61 }
 0x1c0   : > { %v380_v62 = vpop.f32.mrf.mxu3 }
 0x1c1   : > { %v381_v63 = vadd.f32 %v667_v19, %v380_v62 }
 0x1c3   : > { %v400_v0 = vmax.f32 %v381_v63, 0.0 }
 0x1c5   : > { %425 = vst.msk [vmem:[%s948_s15 + $0xaa] sm:$0xff] %vm272_vm0, %v400_v0 }
 0x1c8   : > { %v383_v1 = vpop.f32.mrf.mxu3 }
 0x1c9   : > { %v384_v2 = vadd.f32 %v667_v19, %v383_v1 }
 0x1cb   : > { %v401_v3 = vmax.f32 %v384_v2, 0.0 }
 0x1cd   : > { %426 = vst.msk [vmem:[%s948_s15 + $0xb2] sm:$0xff] %vm272_vm0, %v401_v3 }
 0x1ce PF: > { %s17_s19 = sadd.s32 1, %s798_s19   ;;  %s1058_s10 = sld [smem:[#allocation8_spill]] }
 0x1cf   : > { %p14_p4 = scmp.ge.s32.totalorder %s17_s19, 6   ;;  %s1059_s11 = sld [smem:[#allocation9_spill]] }
 0x1d0   : > { %s1060_s12 = smov %s774_s13  ;;  %s1061_s13 = smov %s778_s14 }
 0x1d1   : > { %s1062_s14 = smov %s909_s25  ;;  %s1063_s15 = smov %s790_s17 }
 0x1d2   : > { %s1064_s16 = smov %s794_s18  ;;  %16 = sbr.rel (!%p14_p4) target bundleno = 8 (0x8), region = 76 }
 0x1d4   : > { %s1065_s17 = smov %s1058_s10 }
 0x1d5   : > { %s1066_s18 = smov %s1059_s11 }
 0x1d7   :  { %467 = vsyncpa [#allocation3], 1 }
 0x1d8   :  { %469 = vsyncpa [#allocation3 + $0x1], 1 }
 0x1d9   :  { %470 = vsyncpa [#allocation5], 1 }

</bundles_post_ra>
